<compile_context>
chip_gen: v6e
topology: v6e:2x2x1
jax: 0.10.0
libtpu: 0.0.40
codegen_flags: <defaults>
</compile_context>

<pallas_src>
from functools import partial

import jax
import jax.numpy as jnp
from jax import lax
from jax.experimental import pallas as pl
from jax.experimental.pallas import tpu as pltpu


# ------------------------- helpers (glue, plain JAX) -------------------------

def round_down_nearest_multiple(num, divisor):
    return num // divisor * divisor


def curtail_to_multiple(t, mult):
    data_len = t.shape[-1]
    return t[..., :round_down_nearest_multiple(data_len, mult)]


def exists(val):
    return val is not None


def _round_up(x, m):
    return (x + m - 1) // m * m


# ------------------------------ fused Pallas kernel ---------------------------

def _fused_kernel(frames_ref, w_ref, b_ref, ct_ref, cn_ref, out_ref, *, gelu_dtype):
    # frames_ref: (tile_n, F)            f32 (streamed; feature dim left unpadded)
    # w_ref:      (F, D)                 matmul dtype (resident)
    # b_ref:      (1, D)                 f32          (resident)
    # ct_ref:     (D, K_pad)             matmul dtype (resident, holds -2 * centroids^T)
    # cn_ref:     (1, K_pad)             f32          (resident, ||c||^2; sentinel on pad)
    # out_ref:    (1, tile_n//128, 128)  int32        (lane-dense index tile)
    x = frames_ref[...].astype(w_ref.dtype)                    # in-kernel f32 -> bf16 cast
    h = jnp.dot(x, w_ref[...], preferred_element_type=jnp.float32) + b_ref[...]
    e = jax.nn.gelu(h.astype(gelu_dtype))                      # bf16 GELU on v6e/v7x

    scores = jnp.dot(e.astype(ct_ref.dtype), ct_ref[...],
                     preferred_element_type=jnp.float32)       # (tile_n, K_pad) = -2 x.c
    # ||x - c||^2 = ||x||^2 - 2 x.c + ||c||^2 ; ||x||^2 is per-row constant -> dropped,
    # and the -2 is already folded into ct_ref, so the distance is a single add.
    dist = scores + cn_ref[...]

    _, rows, lanes = out_ref.shape                             # (1, tile_n//128, 128)
    k_pad = dist.shape[-1]
    d3 = dist.reshape(rows, lanes, k_pad)                      # leading-dim split (free)
    # argmin with first-index tie-break (jnp.argmin does not lower in Mosaic): two lane
    # reductions plus a select against a single broadcast iota lane-row.
    min_val = jnp.min(d3, axis=-1, keepdims=True)
    ids = lax.broadcasted_iota(jnp.int32, (1, 1, k_pad), 2)
    cand = jnp.where(d3 == min_val, ids, k_pad)
    out_ref[...] = jnp.min(cand, axis=-1).reshape(out_ref.shape).astype(jnp.int32)


# ------------------------------ kernel wrapper --------------------------------

def hubert_kmeans_tokens(frames, w, b, ct, cn, *, gelu_dtype=None, max_tile_n=4096):
    """frames: (N, FRAME) f32 -> codebook indices (N,) int32 via one fused kernel."""
    n, f = frames.shape
    f_w, d = w.shape
    k_pad = ct.shape[1]
    assert f_w == f and ct.shape[0] == d
    assert b.shape == (1, d) and cn.shape == (1, k_pad)
    if gelu_dtype is None:
        gelu_dtype = w.dtype

    # Lane-aligned row tiles.  Aim for >= 2 grid steps so both v7x TensorCores get work
    # via the "parallel" axis, capped at max_tile_n so intermediates stay comfortably
    # inside the default scoped-VMEM limits on every generation.
    tile_n = min(max_tile_n, max(128, _round_up(pl.cdiv(n, 2), 128)))
    n_pad = _round_up(n, tile_n)
    n_tiles = n_pad // tile_n
    rows_per_tile = tile_n // 128

    # Pad rows only; the feature dim keeps its true width (no zero traffic and no
    # wrapper-side cast pass -> the streamed frames are ~8x smaller in HBM).
    frames_p = frames if n_pad == n else jnp.pad(frames, ((0, n_pad - n), (0, 0)))

    itemsize = jnp.dtype(w.dtype).itemsize
    cost = pl.CostEstimate(
        flops=2 * n_pad * f * d + 2 * n_pad * d * k_pad,
        transcendentals=n_pad * d,
        bytes_accessed=(n_pad * f * 4 + f * d * itemsize + d * k_pad * itemsize
                        + (d + k_pad) * 4 + n_pad * 4))

    out = pl.pallas_call(
        partial(_fused_kernel, gelu_dtype=gelu_dtype),
        out_shape=jax.ShapeDtypeStruct((n_tiles, rows_per_tile, 128), jnp.int32),
        grid_spec=pltpu.PrefetchScalarGridSpec(
            num_scalar_prefetch=0,
            grid=(n_tiles,),
            in_specs=[
                pl.BlockSpec((tile_n, f), lambda i: (i, 0)),   # streamed frames (f32)
                pl.BlockSpec((f, d), lambda i: (0, 0)),        # resident weight
                pl.BlockSpec((1, d), lambda i: (0, 0)),        # resident bias
                pl.BlockSpec((d, k_pad), lambda i: (0, 0)),    # resident -2*centroids^T
                pl.BlockSpec((1, k_pad), lambda i: (0, 0)),    # resident ||c||^2
            ],
            out_specs=pl.BlockSpec((1, rows_per_tile, 128), lambda i: (i, 0, 0)),
        ),
        compiler_params=pltpu.CompilerParams(
            dimension_semantics=("parallel",)),   # v7x: both TCs share the N axis
        cost_estimate=cost,
    )(frames_p, w, b, ct, cn)
    return out.reshape(-1)[:n]


# ------------------------------ module (JAX port) ------------------------------

class HubertWithKmeans:
    """Synthetic JAX/Pallas port of HubertWithKmeans.forward.

    The real module runs a pretrained HuBERT up to transformer layer 9 and then
    sklearn kmeans.predict.  Here the HuBERT feature extractor is stood in for by a
    deterministic framed-conv + GELU projection, fused with the kmeans distance/argmin
    into one Pallas kernel over synthetic centroids.
    """
    # TODO(synk): the 9-layer HuBERT transformer stack is not replicated here; a single
    # framed-conv projection stands in for `extract_features`.

    def __init__(self, *, frame_size=16, embed_dim=32, n_clusters=64,
                 target_sample_hz=16000, seq_len_multiple_of=None,
                 matmul_dtype=jnp.bfloat16, gelu_dtype=None, key=None):
        self.target_sample_hz = target_sample_hz
        self.seq_len_multiple_of = seq_len_multiple_of
        self.frame_size = frame_size
        self.embed_dim = embed_dim
        self.n_clusters = n_clusters
        self.matmul_dtype = matmul_dtype
        # gelu_dtype=None -> match matmul_dtype (bf16 GELU on v6e/v7x).  On v5e (no
        # bf16 VPU/EUP) pass gelu_dtype=jnp.float32 while keeping bf16 matmuls.
        self.gelu_dtype = gelu_dtype

        key = jax.random.PRNGKey(0) if key is None else key
        k_w, k_b, k_c = jax.random.split(key, 3)
        # "conv" weight over one frame: (FRAME, D), bias: (1, D)
        self.feat_weight = (jax.random.normal(k_w, (frame_size, embed_dim),
                                              dtype=jnp.float32)
                            / jnp.sqrt(frame_size).astype(jnp.float32))
        self.feat_bias = jax.random.normal(k_b, (1, embed_dim), dtype=jnp.float32) * 0.1
        # kmeans cluster centers: (K, D)
        self.kmeans_centroids = jax.random.normal(k_c, (n_clusters, embed_dim),
                                                  dtype=jnp.float32)

        # ---- one-time packing (hoisted out of the kernel body) ----
        # Contraction dims keep their true widths (F=frame_size, D=embed_dim); only the
        # codebook axis is padded to a full 128-lane vreg.
        k_pad = _round_up(n_clusters, 128)
        c_pad = jnp.pad(self.kmeans_centroids, ((0, k_pad - n_clusters), (0, 0)))
        # Centroids exactly as the MXU will see them (bf16-rounded in the bf16 path) so
        # ||c||^2 and the dot term stay self-consistent.
        c_used = c_pad.astype(matmul_dtype).astype(jnp.float32)
        cn = jnp.sum(c_used * c_used, axis=-1)[None, :]
        # Padded centroid rows must never win the argmin; a large finite sentinel is
        # more robust than +inf against any NaN/overflow in low-precision scores.
        cn = jnp.where(jnp.arange(k_pad)[None, :] < n_clusters, cn,
                       1e30).astype(jnp.float32)

        self._w = self.feat_weight.astype(matmul_dtype)            # (F, D)
        self._b = self.feat_bias.astype(jnp.float32)               # (1, D)
        # Fold the -2 of ||x-c||^2 = ||x||^2 - 2 x.c + ||c||^2 into the resident
        # centroid matrix (power-of-two scale -> exact in f32 and bf16).
        self._ct = (-2.0 * c_used.T).astype(matmul_dtype)          # (D, K_pad)
        self._cn = cn                                              # (1, K_pad)

    @property
    def groups(self):
        return 1

    @property
    def codebook_size(self):
        return self.n_clusters

    def forward(self, wav_input, flatten=True, input_sample_hz=None):
        # TODO(synk): audio resampling (torchaudio.functional.resample) has no clean
        # Pallas equivalent; input_sample_hz is assumed == target_sample_hz.
        if exists(self.seq_len_multiple_of):
            wav_input = curtail_to_multiple(wav_input, self.seq_len_multiple_of)

        b, t = wav_input.shape
        n_frames = t // self.frame_size
        # non-overlapping framing + '* d' pack; the waveform is tiny next to the
        # (never-materialized) embedding, so a host reshape is fine here.
        frames = wav_input[:, : n_frames * self.frame_size].reshape(
            b * n_frames, self.frame_size).astype(jnp.float32)

        codebook_indices = hubert_kmeans_tokens(
            frames, self._w, self._b, self._ct, self._cn,
            gelu_dtype=self.gelu_dtype)
        # note: PyTorch returns int64 (.long()); int32 is used here (x64 off).

        if flatten:
            return codebook_indices
        return codebook_indices.reshape(b, n_frames)

    __call__ = forward


# ----------------------------------- main -------------------------------------

if __name__ == "__main__":
    key = jax.random.PRNGKey(0)
    k_model, k_wav, k_wav2 = jax.random.split(key, 3)

    # f32 matmul path -> bit-exact check against a plain-JAX reference
    model = HubertWithKmeans(
        frame_size=16, embed_dim=32, n_clusters=64,
        target_sample_hz=16000, seq_len_multiple_of=64,
        matmul_dtype=jnp.float32, key=k_model,
    )

    def reference_indices(wav, t_curtail):
        # jax.nn.gelu default (tanh approx) matches the kernel; HuBERT's exact erf GELU
        # would differ slightly but both sides here are consistent with each other.
        frames_ref = wav[:, :t_curtail].reshape(-1, 16)
        emb_ref = jax.nn.gelu(frames_ref @ model.feat_weight + model.feat_bias)
        d_ref = (jnp.sum(model.kmeans_centroids ** 2, -1)[None, :]
                 - 2.0 * emb_ref @ model.kmeans_centroids.T)
        return jnp.argmin(d_ref, axis=-1).astype(jnp.int32)

    # small synthetic waveform: batch=2, 520 samples -> curtailed to 512 (single tile)
    wav = jax.random.normal(k_wav, (2, 520), dtype=jnp.float32)
    flat_idx = model(wav, flatten=True)
    unflat_idx = model(wav, flatten=False)
    jax.block_until_ready((flat_idx, unflat_idx))

    assert flat_idx.shape == (2 * (512 // 16),)
    assert unflat_idx.shape == (2, 512 // 16)
    assert flat_idx.dtype == jnp.int32
    assert bool(jnp.all(flat_idx >= 0)) and bool(jnp.all(flat_idx < model.codebook_size))
    assert bool(jnp.all(unflat_idx.reshape(-1) == flat_idx))
    assert bool(jnp.all(reference_indices(wav, 512) == flat_idx))

    # longer waveform: exercises the multi-tile grid (>= 2 steps), row padding and the
    # lane-dense 3-D index output blocks
    wav2 = jax.random.normal(k_wav2, (2, 16700), dtype=jnp.float32)  # curtails to 16640
    flat_idx2 = model(wav2, flatten=True)
    jax.block_until_ready(flat_idx2)
    assert flat_idx2.shape == (2 * (16640 // 16),)
    assert bool(jnp.all(reference_indices(wav2, 16640) == flat_idx2))

    # bf16 MXU + bf16 GELU path (perf default for v6e/v7x): validity checks only
    model_bf16 = HubertWithKmeans(
        frame_size=16, embed_dim=32, n_clusters=64,
        target_sample_hz=16000, seq_len_multiple_of=64,
        matmul_dtype=jnp.bfloat16, key=k_model,
    )
    flat_bf16 = model_bf16(wav, flatten=True)
    jax.block_until_ready(flat_bf16)
    assert flat_bf16.shape == flat_idx.shape and flat_bf16.dtype == jnp.int32
    assert bool(jnp.all(flat_bf16 >= 0))
    assert bool(jnp.all(flat_bf16 < model_bf16.codebook_size))

    # bf16 MXU + f32 GELU path (v5e-style: no bf16 VPU/EUP): validity checks only
    model_v5e = HubertWithKmeans(
        frame_size=16, embed_dim=32, n_clusters=64,
        target_sample_hz=16000, seq_len_multiple_of=64,
        matmul_dtype=jnp.bfloat16, gelu_dtype=jnp.float32, key=k_model,
    )
    flat_v5e = model_v5e(wav, flatten=True)
    jax.block_until_ready(flat_v5e)
    assert flat_v5e.shape == flat_idx.shape and flat_v5e.dtype == jnp.int32
    assert bool(jnp.all(flat_v5e >= 0))
    assert bool(jnp.all(flat_v5e < model_v5e.codebook_size))

    print("KERNEL_OK")
</pallas_src>

<mosaic_0001>
module attributes {stable_mosaic.version = 11 : i64} {
  func.func @_fused_kernel(%arg0: i32, %arg1: memref<128x16xf32, #tpu.memory_space<vmem>>, %arg2: memref<16x32xf32, #tpu.memory_space<vmem>>, %arg3: memref<1x32xf32, #tpu.memory_space<vmem>>, %arg4: memref<32x128xf32, #tpu.memory_space<vmem>>, %arg5: memref<1x128xf32, #tpu.memory_space<vmem>>, %arg6: memref<1x1x128xi32, #tpu.memory_space<vmem>>) attributes {dimension_semantics = [#tpu.dimension_semantics<parallel>], iteration_bounds = array<i64: 1>, scalar_prefetch = 0 : i64, scratch_operands = 0 : i64, tpu.core_type = #tpu.core_type<tc>, window_params = [{transform_indices = @transform_0, window_bounds = array<i64: 128, 16>}, {pipeline_mode = #tpu.pipeline_mode<synchronous>, transform_indices = @transform_1, window_bounds = array<i64: 16, 32>}, {pipeline_mode = #tpu.pipeline_mode<synchronous>, transform_indices = @transform_2, window_bounds = array<i64: 1, 32>}, {pipeline_mode = #tpu.pipeline_mode<synchronous>, transform_indices = @transform_3, window_bounds = array<i64: 32, 128>}, {pipeline_mode = #tpu.pipeline_mode<synchronous>, transform_indices = @transform_4, window_bounds = array<i64: 1, 128>}, {transform_indices = @transform_5, window_bounds = array<i64: 1, 1, 128>}]} {
    %c0 = arith.constant 0 : index
    %c0_0 = arith.constant 0 : index
    %0 = vector.load %arg1[%c0, %c0_0] : memref<128x16xf32, #tpu.memory_space<vmem>>, vector<128x16xf32>
    %c0_1 = arith.constant 0 : index
    %c0_2 = arith.constant 0 : index
    %1 = vector.load %arg2[%c0_1, %c0_2] : memref<16x32xf32, #tpu.memory_space<vmem>>, vector<16x32xf32>
    %cst = arith.constant dense<0.000000e+00> : vector<128x32xf32>
    %2 = tpu.matmul %0, %1, %cst {dimension_numbers = #tpu.dot_dimension_numbers<[1], [0], [0], [1], [0, 0, 1, 1], [], []>} : vector<128x16xf32>, vector<16x32xf32>, vector<128x32xf32> -> vector<128x32xf32>
    %c0_3 = arith.constant 0 : index
    %c0_4 = arith.constant 0 : index
    %3 = vector.load %arg3[%c0_3, %c0_4] : memref<1x32xf32, #tpu.memory_space<vmem>>, vector<1x32xf32>
    %4 = vector.broadcast %3 : vector<1x32xf32> to vector<128x32xf32>
    %5 = arith.addf %2, %4 : vector<128x32xf32>
    %6 = arith.mulf %5, %5 : vector<128x32xf32>
    %7 = arith.mulf %5, %6 : vector<128x32xf32>
    %cst_5 = arith.constant 4.471500e-02 : f32
    %8 = vector.broadcast %cst_5 : f32 to vector<128x32xf32>
    %9 = arith.mulf %8, %7 : vector<128x32xf32>
    %10 = arith.addf %5, %9 : vector<128x32xf32>
    %cst_6 = arith.constant 0.797884583 : f32
    %11 = vector.broadcast %cst_6 : f32 to vector<128x32xf32>
    %12 = arith.mulf %11, %10 : vector<128x32xf32>
    %13 = math.tanh %12 : vector<128x32xf32>
    %cst_7 = arith.constant 1.000000e+00 : f32
    %14 = vector.broadcast %cst_7 : f32 to vector<128x32xf32>
    %15 = arith.addf %14, %13 : vector<128x32xf32>
    %cst_8 = arith.constant 5.000000e-01 : f32
    %16 = vector.broadcast %cst_8 : f32 to vector<128x32xf32>
    %17 = arith.mulf %16, %15 : vector<128x32xf32>
    %18 = arith.mulf %5, %17 : vector<128x32xf32>
    %c0_9 = arith.constant 0 : index
    %c0_10 = arith.constant 0 : index
    %19 = vector.load %arg4[%c0_9, %c0_10] : memref<32x128xf32, #tpu.memory_space<vmem>>, vector<32x128xf32>
    %cst_11 = arith.constant dense<0.000000e+00> : vector<128x128xf32>
    %20 = tpu.matmul %18, %19, %cst_11 {dimension_numbers = #tpu.dot_dimension_numbers<[1], [0], [0], [1], [0, 0, 1, 1], [], []>} : vector<128x32xf32>, vector<32x128xf32>, vector<128x128xf32> -> vector<128x128xf32>
    %c0_12 = arith.constant 0 : index
    %c0_13 = arith.constant 0 : index
    %21 = vector.load %arg5[%c0_12, %c0_13] : memref<1x128xf32, #tpu.memory_space<vmem>>, vector<1x128xf32>
    %22 = vector.broadcast %21 : vector<1x128xf32> to vector<128x128xf32>
    %23 = arith.addf %20, %22 : vector<128x128xf32>
    %24 = vector.shape_cast %23 : vector<128x128xf32> to vector<1x128x128xf32>
    %cst_14 = arith.constant dense<0x7F800000> : vector<1x128xf32>
    %25 = vector.multi_reduction <minimumf>, %24, %cst_14 [2] : vector<1x128x128xf32> to vector<1x128xf32>
    %26 = vector.shape_cast %25 : vector<1x128xf32> to vector<1x128x1xf32>
    %27 = tpu.iota {dimensions = array<i32: 2>} : vector<1x1x128xi32>
    %28 = vector.broadcast %26 : vector<1x128x1xf32> to vector<1x128x128xf32>
    %29 = arith.cmpf oeq, %24, %28 : vector<1x128x128xf32>
    %c128_i32 = arith.constant 128 : i32
    %30 = vector.shape_cast %27 : vector<1x1x128xi32> to vector<1x1x128xi32>
    %31 = vector.broadcast %30 : vector<1x1x128xi32> to vector<1x128x128xi32>
    %32 = vector.broadcast %c128_i32 : i32 to vector<1x128x128xi32>
    %33 = arith.select %29, %31, %32 : vector<1x128x128xi1>, vector<1x128x128xi32>
    %cst_15 = arith.constant dense<2147483647> : vector<1x128xi32>
    %34 = vector.multi_reduction <minsi>, %33, %cst_15 [2] : vector<1x128x128xi32> to vector<1x128xi32>
    %35 = vector.shape_cast %34 : vector<1x128xi32> to vector<1x1x128xi32>
    %c0_16 = arith.constant 0 : index
    %c0_17 = arith.constant 0 : index
    %c0_18 = arith.constant 0 : index
    %36 = vector.load %arg6[%c0_16, %c0_17, %c0_18] : memref<1x1x128xi32, #tpu.memory_space<vmem>>, vector<1x1x128xi32>
    tpu.vector_store %arg6[%c0_16, %c0_17, %c0_18], %35 {strides = array<i32>} : memref<1x1x128xi32, #tpu.memory_space<vmem>>, vector<1x1x128xi32>,
    return
  }
  func.func @transform_0(%arg0: i32) -> (i32, i32) {
    %c0_i32 = arith.constant 0 : i32
    %c0_i32_0 = arith.constant 0 : i32
    return %arg0, %c0_i32 : i32, i32
  }
  func.func @transform_1(%arg0: i32) -> (i32, i32) {
    %c0_i32 = arith.constant 0 : i32
    %c0_i32_0 = arith.constant 0 : i32
    %c0_i32_1 = arith.constant 0 : i32
    return %c0_i32, %c0_i32_0 : i32, i32
  }
  func.func @transform_2(%arg0: i32) -> (i32, i32) {
    %c0_i32 = arith.constant 0 : i32
    %c0_i32_0 = arith.constant 0 : i32
    %c0_i32_1 = arith.constant 0 : i32
    return %c0_i32, %c0_i32_0 : i32, i32
  }
  func.func @transform_3(%arg0: i32) -> (i32, i32) {
    %c0_i32 = arith.constant 0 : i32
    %c0_i32_0 = arith.constant 0 : i32
    %c0_i32_1 = arith.constant 0 : i32
    return %c0_i32, %c0_i32_0 : i32, i32
  }
  func.func @transform_4(%arg0: i32) -> (i32, i32) {
    %c0_i32 = arith.constant 0 : i32
    %c0_i32_0 = arith.constant 0 : i32
    %c0_i32_1 = arith.constant 0 : i32
    return %c0_i32, %c0_i32_0 : i32, i32
  }
  func.func @transform_5(%arg0: i32) -> (i32, i32, i32) {
    %c0_i32 = arith.constant 0 : i32
    %c0_i32_0 = arith.constant 0 : i32
    %c0_i32_1 = arith.constant 0 : i32
    return %arg0, %c0_i32, %c0_i32_0 : i32, i32, i32
  }
}

</mosaic_0001>

<bundles_post_ra>
// kernel: tpu_custom_call.1
= control target key start
LH: loop header
LB: loop body
LE: loop exit
PB: predicated region body
PF: predicated region fallthrough
CT: control target
= control target key end

     0   :  { %vm46_vm0 = vcmask 130048   ;;  %s1759_s0 = inlined_call_operand.vmem [shape: f32[128,16], index: 0, kind: input, shape index: {}]   ;;  %s1760_s1 = inlined_call_operand.vmem [shape: f32[16,32], index: 1, kind: input, shape index: {}]   ;;  %s1761_s2 = inlined_call_operand.vmem [shape: f32[1,32], index: 2, kind: input, shape index: {}]   ;;  %s1762_s3 = inlined_call_operand.vmem [shape: f32[32,128], index: 3, kind: input, shape index: {}]   ;;  %s1763_s4 = inlined_call_operand.vmem [shape: f32[1,128], index: 4, kind: input, shape index: {}]   ;;  %s1764_s5 = inlined_call_operand.hbm [shape: s32[1,1,128], index: 5, kind: output, shape index: {}]  }
   0x1   :  { %v38_v0 = vld [vmem:[%s1760_s1 + $0x8] sm:$0xff]  ;;  %v37_v1 = vld [vmem:[%s1760_s1] sm:$0xff]  ;;  %v23_v4 = vld [vmem:[%s1759_s0 + $0x10] sm:$0xff] }
   0x2   :  { %v21_v2 = vld [vmem:[%s1759_s0] sm:$0xff]  ;;  %1075 = vmatprep.subr.mxu0 %v38_v0  ;;  %v22_v3 = vld [vmem:[%s1759_s0 + $0x8] sm:$0xff]  ;;  %v24_v5 = vld [vmem:[%s1759_s0 + $0x18] sm:$0xff] }
   0x3   :  { %1079 = vmatprep.mubr.msk.f32.mxu0 %vm46_vm0, %v21_v2  ;;  %1076 = vmatpush3.msra.mxu0 %v38_v0 }
   0x4   :  { %1077 = vmatprep.subr.mxu0 %v37_v1 }
   0x5   :  { %1078 = vmatpush3.msra.mxu0 %v37_v1 }
   0x6   :  { %1080 = vmatmul.mubr.msk.f32.vlgmr.msra.gmra.mxu0 %vm46_vm0, %v22_v3 }
   0x7   :  { %1082 = vmatprep.mubr.msk.f32.mxu0 %vm46_vm0, %v23_v4 }
   0x8   :  { %10 = vsyncpa [#allocation3], 0  ;;  %v25_v6 = vld [vmem:[%s1759_s0 + $0x20] sm:$0xff]  ;;  %v26_v7 = vld [vmem:[%s1759_s0 + $0x28] sm:$0xff]  ;;  %vm395_vm1 = vcmask 261120  }
   0x9   :  { %v27_v8 = vld [vmem:[%s1759_s0 + $0x30] sm:$0xff]  ;;  %v28_v9 = vld [vmem:[%s1759_s0 + $0x38] sm:$0xff]  ;;  %v29_v10 = vld [vmem:[%s1759_s0 + $0x40] sm:$0xff] }
   0xa   :  { %1083 = vmatmul.mubr.msk.f32.gmra.mxu0 %vm46_vm0, %v24_v5  ;;  %v30_v11 = vld [vmem:[%s1759_s0 + $0x48] sm:$0xff]  ;;  %v31_v12 = vld [vmem:[%s1759_s0 + $0x50] sm:$0xff]  ;;  %v32_v13 = vld [vmem:[%s1759_s0 + $0x58] sm:$0xff] }
   0xb   :  { %1085 = vmatprep.mubr.msk.f32.mxu0 %vm46_vm0, %v25_v6  ;;  %v33_v14 = vld [vmem:[%s1759_s0 + $0x60] sm:$0xff]  ;;  %v34_v15 = vld [vmem:[%s1759_s0 + $0x68] sm:$0xff]  ;;  %v35_v16 = vld [vmem:[%s1759_s0 + $0x70] sm:$0xff] }
   0xc   :  { %v36_v17 = vld [vmem:[%s1759_s0 + $0x78] sm:$0xff]  ;;  %v386_v19 = vld [vmem:[%s1762_s3 + $0x10] sm:$0xff]  ;;  %v385_v20 = vld [vmem:[%s1762_s3 + $0x8] sm:$0xff] }
   0xd   :  { %v387_v18 = vld [vmem:[%s1762_s3 + $0x18] sm:$0xff]  ;;  %v384_v21 = vld [vmem:[%s1762_s3] sm:$0xff] }
   0xe   :  { %1086 = vmatmul.mubr.msk.f32.gmra.mxu0 %vm46_vm0, %v26_v7  ;;  %1103 = vmatprep.subr.mxu1 %v387_v18  ;;  %v1306_v22 = vld [vmem:[%s1761_s2] ss:$0 sm:$0xff] }
   0xf   :  { %1088 = vmatprep.mubr.msk.f32.mxu0 %vm46_vm0, %v27_v8  ;;  %1104 = vmatpush3.msra.mxu1 %v387_v18 }
  0x10   :  { %1105 = vmatprep.subr.mxu1 %v386_v19 }
  0x11   :  { %1106 = vmatpush3.msra.mxu1 %v386_v19 }
  0x12   :  { %1089 = vmatmul.mubr.msk.f32.gmra.mxu0 %vm46_vm0, %v28_v9  ;;  %1107 = vmatprep.subr.mxu1 %v385_v20 }
  0x13   :  { %1091 = vmatprep.mubr.msk.f32.mxu0 %vm46_vm0, %v29_v10  ;;  %1108 = vmatpush3.msra.mxu1 %v385_v20 }
  0x14   :  { %1109 = vmatprep.subr.mxu1 %v384_v21 }
  0x15   :  { %1110 = vmatpush3.msra.mxu1 %v384_v21 }
  0x16   :  { %1092 = vmatmul.mubr.msk.f32.gmra.mxu0 %vm46_vm0, %v30_v11 }
  0x17   :  { %1094 = vmatprep.mubr.msk.f32.mxu0 %vm46_vm0, %v31_v12 }
  0x1a   :  { %1095 = vmatmul.mubr.msk.f32.gmra.mxu0 %vm46_vm0, %v32_v13 }
  0x1b   :  { %1097 = vmatprep.mubr.msk.f32.mxu0 %vm46_vm0, %v33_v14 }
  0x1e   :  { %1098 = vmatmul.mubr.msk.f32.gmra.mxu0 %vm46_vm0, %v34_v15 }
  0x1f   :  { %1100 = vmatprep.mubr.msk.f32.mxu0 %vm46_vm0, %v35_v16 }
  0x22   :  { %1101 = vmatmul.mubr.msk.f32.gmra.mxu0 %vm46_vm0, %v36_v17 }
  0xc6   :  { %v1081_v23 = vpop.f32.mrf.mxu0 }
  0xc7   :  { %v1309_v24 = vadd.f32 %v1081_v23, %v1306_v22 }
  0xc8   :  { %v161_v25 = vpop.f32.mrf.mxu0 }
  0xc9   :  { %v241_v26 = vmul.f32 %v1309_v24, %v1309_v24  ;;  %v1314_v27 = vadd.f32 %v1306_v22, %v161_v25 }
  0xca   :  { %v1084_v28 = vpop.f32.mrf.mxu0 }
  0xcb   :  { %v257_v29 = vmul.f32 %v241_v26, %v1309_v24  ;;  %v240_v30 = vmul.f32 %v1314_v27, %v1314_v27  ;;  %v1320_v31 = vadd.f32 %v1084_v28, %v1306_v22 }
  0xcc   :  { %v171_v32 = vpop.f32.mrf.mxu0 }
  0xcd   :  { %v273_v33 = vmul.f32 0.044715, %v257_v29  ;;  %v256_v34 = vmul.f32 %v240_v30, %v1314_v27  ;;  %v243_v35 = vmul.f32 %v1320_v31, %v1320_v31  ;;  %v1326_v36 = vadd.f32 %v1306_v22, %v171_v32 }
  0xce   :  { %v1087_v37 = vpop.f32.mrf.mxu0 }
  0xcf   :  { %v289_v38 = vadd.f32 %v273_v33, %v1309_v24  ;;  %v272_v39 = vmul.f32 0.044715, %v256_v34  ;;  %v259_v40 = vmul.f32 %v243_v35, %v1320_v31  ;;  %v242_v41 = vmul.f32 %v1326_v36, %v1326_v36 }
  0xd0   :  { %v1333_v42 = vadd.f32 %v1087_v37, %v1306_v22  ;;  %v181_v43 = vpop.f32.mrf.mxu0 }
  0xd1   :  { %v305_v44 = vmul.f32 0.7978846, %v289_v38  ;;  %v275_v45 = vmul.f32 0.044715, %v259_v40  ;;  %v258_v46 = vmul.f32 %v242_v41, %v1326_v36  ;;  %v1337_v47 = vadd.f32 %v1306_v22, %v181_v43 }
  0xd2   :  { %v245_v48 = vmul.f32 %v1333_v42, %v1333_v42  ;;  %v1090_v49 = vpop.f32.mrf.mxu0  ;;  %v288_v50 = vadd.f32 %v272_v39, %v1314_v27 }
  0xd3   :  { %1136 = vtanh.f32 %v305_v44  ;;  %v291_v51 = vadd.f32 %v275_v45, %v1320_v31  ;;  %v274_v52 = vmul.f32 0.044715, %v258_v46  ;;  %v244_v53 = vmul.f32 %v1337_v47, %v1337_v47 }
  0xd4   :  { %v261_v54 = vmul.f32 %v245_v48, %v1333_v42  ;;  %v1347_v55 = vadd.f32 %v1090_v49, %v1306_v22  ;;  %v191_v56 = vpop.f32.mrf.mxu0  ;;  %v304_v57 = vmul.f32 0.7978846, %v288_v50 }
  0xd5   :  { %v290_v58 = vadd.f32 %v274_v52, %v1326_v36  ;;  %v260_v59 = vmul.f32 %v244_v53, %v1337_v47  ;;  %v1352_v60 = vadd.f32 %v1306_v22, %v191_v56  ;;  %v307_v61 = vmul.f32 0.7978846, %v291_v51 }
  0xd6   :  { %v277_v62 = vmul.f32 0.044715, %v261_v54  ;;  %v247_v63 = vmul.f32 %v1347_v55, %v1347_v55  ;;  %v1093_v0 = vpop.f32.mrf.mxu0  ;;  %1138 = vtanh.f32 %v304_v57 }
  0xd7   :  { %v306_v1 = vmul.f32 0.7978846, %v290_v58  ;;  %v276_v2 = vmul.f32 0.044715, %v260_v59  ;;  %v246_v3 = vmul.f32 %v1352_v60, %v1352_v60  ;;  %v1361_v6 = vadd.f32 %v1093_v0, %v1306_v22 }
  0xd8   :  { %v293_v4 = vadd.f32 %v277_v62, %v1333_v42  ;;  %v263_v5 = vmul.f32 %v247_v63, %v1347_v55  ;;  %v201_v7 = vpop.f32.mrf.mxu0 }
  0xd9   :  { %1140 = vtanh.f32 %v306_v1  ;;  %v292_v8 = vadd.f32 %v276_v2, %v1337_v47  ;;  %v262_v9 = vmul.f32 %v246_v3, %v1352_v60  ;;  %v1366_v10 = vadd.f32 %v1306_v22, %v201_v7 }
  0xda   :  { %1142 = vtanh.f32 %v307_v61  ;;  %v309_v11 = vmul.f32 0.7978846, %v293_v4  ;;  %v279_v12 = vmul.f32 0.044715, %v263_v5  ;;  %v249_v13 = vmul.f32 %v1361_v6, %v1361_v6  ;;  %v1096_v14 = vpop.f32.mrf.mxu0 }
  0xdb   :  { %v308_v15 = vmul.f32 0.7978846, %v292_v8  ;;  %v278_v16 = vmul.f32 0.044715, %v262_v9  ;;  %v248_v17 = vmul.f32 %v1366_v10, %v1366_v10  ;;  %v1373_v18 = vadd.f32 %v1096_v14, %v1306_v22 }
  0xdc   :  { %1144 = vtanh.f32 %v309_v11  ;;  %v295_v19 = vadd.f32 %v279_v12, %v1347_v55  ;;  %v265_v20 = vmul.f32 %v249_v13, %v1361_v6  ;;  %v211_v21 = vpop.f32.mrf.mxu0 }
  0xdd   :  { %1146 = vtanh.f32 %v308_v15  ;;  %v294_v23 = vadd.f32 %v278_v16, %v1352_v60  ;;  %v264_v25 = vmul.f32 %v248_v17, %v1366_v10  ;;  %v251_v26 = vmul.f32 %v1373_v18, %v1373_v18 }
  0xde   :  { %v311_v28 = vmul.f32 0.7978846, %v295_v19  ;;  %v281_v29 = vmul.f32 0.044715, %v265_v20  ;;  %v1382_v30 = vadd.f32 %v1306_v22, %v211_v21  ;;  %v1099_v32 = vpop.f32.mrf.mxu0 }
  0xdf   :  { %v310_v33 = vmul.f32 0.7978846, %v294_v23  ;;  %v280_v34 = vmul.f32 0.044715, %v264_v25  ;;  %v267_v35 = vmul.f32 %v251_v26, %v1373_v18  ;;  %v1386_v37 = vadd.f32 %v1099_v32, %v1306_v22 }
  0xe0   :  { %v1137_v38 = vpop.eup %1136  ;;  %1148 = vtanh.f32 %v311_v28  ;;  %v297_v39 = vadd.f32 %v281_v29, %v1361_v6  ;;  %v250_v40 = vmul.f32 %v1382_v30, %v1382_v30  ;;  %v221_v41 = vpop.f32.mrf.mxu0 }
  0xe1   :  { %1150 = vtanh.f32 %v310_v33  ;;  %v296_v43 = vadd.f32 %v280_v34, %v1366_v10  ;;  %v283_v44 = vmul.f32 0.044715, %v267_v35  ;;  %v253_v45 = vmul.f32 %v1386_v37, %v1386_v37 }
  0xe2   :  { %v313_v46 = vmul.f32 0.7978846, %v297_v39  ;;  %v266_v48 = vmul.f32 %v250_v40, %v1382_v30  ;;  %v1396_v49 = vadd.f32 %v1306_v22, %v221_v41  ;;  %v1102_v50 = vpop.f32.mrf.mxu0  ;;  %v337_v51 = vadd.f32 1.0, %v1137_v38 }
  0xe3   :  { %v1139_v52 = vpop.eup %1138  ;;  %v312_v53 = vmul.f32 0.7978846, %v296_v43  ;;  %v299_v54 = vadd.f32 %v283_v44, %v1373_v18  ;;  %v269_v56 = vmul.f32 %v253_v45, %v1386_v37  ;;  %v1401_v57 = vadd.f32 %v1102_v50, %v1306_v22 }
  0xe4   :  { %1152 = vtanh.f32 %v313_v46  ;;  %v282_v58 = vmul.f32 0.044715, %v266_v48  ;;  %v252_v59 = vmul.f32 %v1396_v49, %v1396_v49  ;;  %v231_v61 = vpop.f32.mrf.mxu0  ;;  %v336_v62 = vadd.f32 1.0, %v1139_v52 }
  0xe5   :  { %1154 = vtanh.f32 %v312_v53  ;;  %v315_v63 = vmul.f32 0.7978846, %v299_v54  ;;  %v285_v0 = vmul.f32 0.044715, %v269_v56  ;;  %v255_v1 = vmul.f32 %v1401_v57, %v1401_v57 }
  0xe6   :  { %v1141_v2 = vpop.eup %1140  ;;  %v298_v3 = vadd.f32 %v282_v58, %v1382_v30  ;;  %v268_v4 = vmul.f32 %v252_v59, %v1396_v49  ;;  %v1410_v5 = vadd.f32 %v1306_v22, %v231_v61  ;;  %v352_v7 = vmul.f32 0.5, %v336_v62 }
  0xe7   :  { %v1143_v8 = vpop.eup %1142  ;;  %1156 = vtanh.f32 %v315_v63  ;;  %v301_v9 = vadd.f32 %v285_v0, %v1386_v37  ;;  %v271_v11 = vmul.f32 %v255_v1, %v1401_v57  ;;  %v353_v12 = vmul.f32 0.5, %v337_v51 }
  0xe8   :  { %v314_v13 = vmul.f32 0.7978846, %v298_v3  ;;  %v284_v14 = vmul.f32 0.044715, %v268_v4  ;;  %v254_v15 = vmul.f32 %v1410_v5, %v1410_v5  ;;  %v368_v16 = vmul.f32 %v352_v7, %v1314_v27 }
  0xe9   :  { %v1145_v17 = vpop.eup %1144  ;;  %v317_v19 = vmul.f32 0.7978846, %v301_v9  ;;  %v287_v20 = vmul.f32 0.044715, %v271_v11  ;;  %v369_v22 = vmul.f32 %v353_v12, %v1309_v24  ;;  %v338_v21 = vadd.f32 1.0, %v1141_v2 }
  0xea   :  { %v1147_v23 = vpop.eup %1146  ;;  %1158 = vtanh.f32 %v314_v13  ;;  %v300_v25 = vadd.f32 %v284_v14, %v1396_v49  ;;  %v270_v26 = vmul.f32 %v254_v15, %v1410_v5  ;;  %1111 = vmatprep.mubr.msk.f32.mxu1 %vm395_vm1, %v368_v16  ;;  %v339_v28 = vadd.f32 1.0, %v1143_v8 }
  0xeb   :  { %1160 = vtanh.f32 %v317_v19  ;;  %v303_v29 = vadd.f32 %v287_v20, %v1401_v57  ;;  %1112 = vmatmul.mubr.msk.f32.vlgmr.msra.gmra.mxu1 %vm395_vm1, %v369_v22  ;;  %v354_v27 = vmul.f32 0.5, %v338_v21  ;;  %v340_v32 = vadd.f32 1.0, %v1147_v23 }
  0xec   :  { %v316_v33 = vmul.f32 0.7978846, %v300_v25  ;;  %v286_v34 = vmul.f32 0.044715, %v270_v26  ;;  %v355_v24 = vmul.f32 0.5, %v339_v28  ;;  %v341_v35 = vadd.f32 1.0, %v1145_v17 }
  0xed   :  { %v1149_v38 = vpop.eup %1148  ;;  %v319_v39 = vmul.f32 0.7978846, %v303_v29  ;;  %v370_v40 = vmul.f32 %v354_v27, %v1326_v36  ;;  %v356_v41 = vmul.f32 0.5, %v340_v32 }
  0xee   :  { %v1151_v43 = vpop.eup %1150  ;;  %1162 = vtanh.f32 %v316_v33  ;;  %v302_v44 = vadd.f32 %v286_v34, %v1410_v5  ;;  %v371_v45 = vmul.f32 %v355_v24, %v1320_v31  ;;  %v357_v46 = vmul.f32 0.5, %v341_v35 }
  0xef   :  { %1164 = vtanh.f32 %v319_v39  ;;  %1114 = vmatprep.mubr.msk.f32.mxu1 %vm395_vm1, %v370_v40  ;;  %v372_v48 = vmul.f32 %v356_v41, %v1337_v47  ;;  %v342_v50 = vadd.f32 1.0, %v1151_v43  ;;  %v343_v51 = vadd.f32 1.0, %v1149_v38 }
  0xf0   :  { %v318_v52 = vmul.f32 0.7978846, %v302_v44  ;;  %1115 = vmatmul.mubr.msk.f32.gmra.mxu1 %vm395_vm1, %v371_v45  ;;  %v373_v56 = vmul.f32 %v357_v46, %v1333_v42 }
  0xf1   :  { %v1153_v53 = vpop.eup %1152  ;;  %1117 = vmatprep.mubr.msk.f32.mxu1 %vm395_vm1, %v372_v48  ;;  %v358_v36 = vmul.f32 0.5, %v342_v50  ;;  %v359_v31 = vmul.f32 0.5, %v343_v51 }
  0xf2   :  { %v1155_v54 = vpop.eup %1154  ;;  %1166 = vtanh.f32 %v318_v52  ;;  %v345_v58 = vadd.f32 1.0, %v1153_v53 }
  0xf3   :  { %v374_v59 = vmul.f32 %v358_v36, %v1352_v60  ;;  %v344_v61 = vadd.f32 1.0, %v1155_v54  ;;  %v375_v63 = vmul.f32 %v359_v31, %v1347_v55 }
  0xf4   :  { %v1157_v62 = vpop.eup %1156  ;;  %1118 = vmatmul.mubr.msk.f32.gmra.mxu1 %vm395_vm1, %v373_v56  ;;  %v361_v0 = vmul.f32 0.5, %v345_v58 }
  0xf5   :  { %1120 = vmatprep.mubr.msk.f32.mxu1 %vm395_vm1, %v374_v59  ;;  %v360_v47 = vmul.f32 0.5, %v344_v61  ;;  %v347_v1 = vadd.f32 1.0, %v1157_v62  ;;  %v621_v59 = vlaneseq }
  0xf6   :  { %v377_v60 = vmul.f32 %v361_v0, %v1361_v6 }
  0xf7   :  { %v1159_v2 = vpop.eup %1158  ;;  %v376_v3 = vmul.f32 %v360_v47, %v1366_v10  ;;  %v363_v8 = vmul.f32 0.5, %v347_v1  ;;  %v1489_v61 = vand.u32 127, %v621_v59 }
  0xf8   :  { %v1161_v4 = vpop.eup %1160  ;;  %1121 = vmatmul.mubr.msk.f32.gmra.mxu1 %vm395_vm1, %v375_v63  ;;  %v346_v42 = vadd.f32 1.0, %v1159_v2 }
  0xf9   :  { %1123 = vmatprep.mubr.msk.f32.mxu1 %vm395_vm1, %v376_v3  ;;  %v349_v9 = vadd.f32 1.0, %v1161_v4  ;;  %v379_v10 = vmul.f32 %v363_v8, %v1373_v18 }
  0xfa   :  { %v362_v7 = vmul.f32 0.5, %v346_v42 }
  0xfb   :  { %v1163_v11 = vpop.eup %1162  ;;  %v365_v15 = vmul.f32 0.5, %v349_v9 }
  0xfc   :  { %v1165_v12 = vpop.eup %1164  ;;  %1124 = vmatmul.mubr.msk.f32.gmra.mxu1 %vm395_vm1, %v377_v60  ;;  %v378_v55 = vmul.f32 %v362_v7, %v1382_v30  ;;  %v348_v13 = vadd.f32 1.0, %v1163_v11 }
  0xfd   :  { %v351_v16 = vadd.f32 1.0, %v1165_v12  ;;  %v381_v20 = vmul.f32 %v365_v15, %v1386_v37 }
  0xfe   :  { %1126 = vmatprep.mubr.msk.f32.mxu1 %vm395_vm1, %v378_v55  ;;  %v364_v14 = vmul.f32 0.5, %v348_v13 }
  0xff   :  { %v1167_v17 = vpop.eup %1166  ;;  %v367_v30 = vmul.f32 0.5, %v351_v16 }
 0x100   :  { %1127 = vmatmul.mubr.msk.f32.gmra.mxu1 %vm395_vm1, %v379_v10  ;;  %v380_v6 = vmul.f32 %v364_v14, %v1396_v49  ;;  %v350_v19 = vadd.f32 1.0, %v1167_v17  ;;  %v1020_v49 = vld [vmem:[%s1763_s4] ss:$0 sm:$0xff]  ;;  %s1190_s4 = smov [#allocation2]  }
 0x101   :  { %v383_v18 = vmul.f32 %v367_v30, %v1401_v57  ;;  %s995_s11 = sshll.u32 %s1190_s4, 4  ;;  %s996_s11 = int_to_ptr.vmem [resolvable:$true] %s995_s11 }
 0x102   :  { %1129 = vmatprep.mubr.msk.f32.mxu1 %vm395_vm1, %v380_v6  ;;  %v366_v22 = vmul.f32 0.5, %v350_v19  ;;  %s1168_s12 = scalar_lea.vmem %s996_s11, 16  ;;  %s1172_s13 = scalar_lea.vmem %s996_s11, 32 }
 0x103   :  { %p1169_p0 = scmp.ne.s32.totalorder %s996_s11, %s1168_s12  ;;  %p1173_p1 = scmp.lt.s32.totalorder %s996_s11, %s996_s11 }
 0x104   :  { %1130 = vmatmul.mubr.msk.f32.gmra.mxu1 %vm395_vm1, %v381_v20  ;;  %v382_v21 = vmul.f32 %v366_v22, %v1410_v5  ;;  %p1174_p2 = scmp.lt.s32.totalorder %s1172_s13, %s1168_s12 }
 0x106   :  { %1132 = vmatprep.mubr.msk.f32.mxu1 %vm395_vm1, %v382_v21  ;;  %p1175_p3 = por %p1174_p2, %p1173_p1 }
 0x108   :  { %1133 = vmatmul.mubr.msk.f32.gmra.mxu1 %vm395_vm1, %v383_v18  ;;  %p1176_p4 = pnand %p1175_p3, %p1169_p0 }
 0x1ab   :  { %v1113_v23 = vpop.f32.mrf.mxu1 }
 0x1ac   :  { %v516_v25 = vadd.f32 %v1113_v23, %v1020_v49 }
 0x1ad   :  { %v510_v26 = vpop.f32.mrf.mxu1 }
 0x1ae   :  { %591 = vmin.xlane.f32.xlu0 %v516_v25  ;;  %v511_v37 = vadd.f32 %v1020_v49, %v510_v26 }
 0x1b0   :  { %v1116_v28 = vpop.f32.mrf.mxu1 }
 0x1b1   :  { %v526_v29 = vadd.f32 %v1116_v28, %v1020_v49 }
 0x1b2   :  { %v520_v27 = vpop.f32.mrf.mxu1  ;;  %589 = vmin.xlane.f32.xlu0 %v511_v37 }
 0x1b3   :  { %595 = vmin.xlane.f32.xlu1 %v526_v29  ;;  %v521_v32 = vadd.f32 %v1020_v49, %v520_v27 }
 0x1b4   :  { %v1119_v5 = vpop.f32.mrf.mxu1 }
 0x1b5   :  { %v1455_v24 = vadd.f32 %v1119_v5, %v1020_v49 }
 0x1b6   :  { %v530_v33 = vpop.f32.mrf.mxu1 }
 0x1b7   :  { %v531_v57 = vadd.f32 %v1020_v49, %v530_v33  ;;  %593 = vmin.xlane.f32.xlu1 %v521_v32 }
 0x1b8   :  { %v1122_v34 = vpop.f32.mrf.mxu1 }
 0x1b9   :  { %597 = vmin.xlane.f32.xlu0 %v531_v57  ;;  %v1460_v40 = vadd.f32 %v1122_v34, %v1020_v49 }
 0x1ba   :  { %v540_v35 = vpop.f32.mrf.mxu1 }
 0x1bb   :  { %v1457_v38 = vadd.f32 %v1020_v49, %v540_v35  ;;  %599 = vmin.xlane.f32.xlu1 %v1455_v24 }
 0x1bc   :  { %v1125_v39 = vpop.f32.mrf.mxu1 }
 0x1bd   :  { %601 = vmin.xlane.f32.xlu0 %v1457_v38  ;;  %v1466_v45 = vadd.f32 %v1125_v39, %v1020_v49 }
 0x1be   :  { %v550_v41 = vpop.f32.mrf.mxu1 }
 0x1bf   :  { %v1463_v43 = vadd.f32 %v1020_v49, %v550_v41  ;;  %603 = vmin.xlane.f32.xlu1 %v1460_v40 }
 0x1c0   :  { %v1128_v44 = vpop.f32.mrf.mxu1 }
 0x1c1   :  { %605 = vmin.xlane.f32.xlu0 %v1463_v43  ;;  %v1472_v51 = vadd.f32 %v1128_v44, %v1020_v49 }
 0x1c2   :  { %v560_v46 = vpop.f32.mrf.mxu1 }
 0x1c3   :  { %v1469_v48 = vadd.f32 %v1020_v49, %v560_v46  ;;  %607 = vmin.xlane.f32.xlu1 %v1466_v45 }
 0x1c4   :  { %v1131_v50 = vpop.f32.mrf.mxu1 }
 0x1c5   :  { %609 = vmin.xlane.f32.xlu0 %v1469_v48  ;;  %v1478_v54 = vadd.f32 %v1131_v50, %v1020_v49 }
 0x1c6   :  { %v570_v52 = vpop.f32.mrf.mxu1 }
 0x1c7   :  { %v1475_v53 = vadd.f32 %v1020_v49, %v570_v52  ;;  %611 = vmin.xlane.f32.xlu1 %v1472_v51 }
 0x1c8   :  { %v1134_v36 = vpop.f32.mrf.mxu1 }
 0x1c9   :  { %613 = vmin.xlane.f32.xlu0 %v1475_v53  ;;  %v1484_v58 = vadd.f32 %v1134_v36, %v1020_v49 }
 0x1ca   :  { %v580_v56 = vpop.f32.mrf.mxu1 }
 0x1cb   :  { %v1481_v31 = vadd.f32 %v1020_v49, %v580_v56  ;;  %615 = vmin.xlane.f32.xlu1 %v1478_v54 }
 0x1cd   :  { %617 = vmin.xlane.f32.xlu0 %v1481_v31 }
 0x1cf   :  { %619 = vmin.xlane.f32.xlu1 %v1484_v58 }
 0x237   :  { %v592_v62 = vpop.xlane.xlu0 %591 }
 0x238   :  { %vm624_vm2 = vcmp.eq.f32.partialorder %v516_v25, %v592_v62 }
 0x239   :  { %v1492_v47 = vsel %vm624_vm2, %v1489_v61, 128 }
 0x23a   :  { %v670_v63 = vshra.s32 %v1492_v47, 16 }
 0x23b   :  { %v590_v0 = vpop.xlane.xlu0 %589 }
 0x23c   :  { %v596_v1 = vpop.xlane.xlu1 %595  ;;  %vm623_vm3 = vcmp.eq.f32.partialorder %v511_v37, %v590_v0  ;;  %v1495_v2 = vcvt.s32.f32 %v670_v63 }
 0x23d   :  { %vm626_vm4 = vcmp.eq.f32.partialorder %v526_v29, %v596_v1  ;;  %v1498_v3 = vsel %vm623_vm3, %v1489_v61, 128 }
 0x23e   :  { %v1501_v4 = vsel %vm626_vm4, %v1489_v61, 128  ;;  %673 = vmin.xlane.f32.xlu1 %v1495_v2  ;;  %v656_v42 = vshra.s32 %v1498_v3, 16  ;;  %v655_v1 = vand.u32 65535, %v1498_v3 }
 0x23f   :  { %v698_v60 = vshra.s32 %v1501_v4, 16 }
 0x240   :  { %v594_v7 = vpop.xlane.xlu1 %593  ;;  %v1506_v8 = vcvt.s32.f32 %v656_v42 }
 0x241   :  { %vm625_vm5 = vcmp.eq.f32.partialorder %v521_v32, %v594_v7  ;;  %v1508_v9 = vcvt.s32.f32 %v698_v60  ;;  %v697_v7 = vand.u32 65535, %v1501_v4 }
 0x242   :  { %v1511_v11 = vsel %vm625_vm5, %v1489_v61, 128  ;;  %v598_v12 = vpop.xlane.xlu0 %597  ;;  %659 = vmin.xlane.f32.xlu0 %v1506_v8 }
 0x243   :  { %vm627_vm6 = vcmp.eq.f32.partialorder %v531_v57, %v598_v12  ;;  %701 = vmin.xlane.f32.xlu1 %v1508_v9  ;;  %v684_v55 = vshra.s32 %v1511_v11, 16 }
 0x244   :  { %v1517_v13 = vsel %vm627_vm6, %v1489_v61, 128  ;;  %v600_v10 = vpop.xlane.xlu1 %599 }
 0x245   :  { %vm628_vm7 = vcmp.eq.f32.partialorder %v1455_v24, %v600_v10  ;;  %v1520_v14 = vcvt.s32.f32 %v684_v55  ;;  %v712_v15 = vshra.s32 %v1517_v13, 16  ;;  %v657_v10 = vcvt.s32.f32 %v655_v1 }
 0x246   :  { %v1524_v16 = vsel %vm628_vm7, %v1489_v61, 128  ;;  %v602_v17 = vpop.xlane.xlu0 %601 }
 0x247   :  { %vm629_vm8 = vcmp.eq.f32.partialorder %v1457_v38, %v602_v17  ;;  %687 = vmin.xlane.f32.xlu0 %v1520_v14  ;;  %v726_v6 = vshra.s32 %v1524_v16, 16  ;;  %v1535_v30 = vcvt.s32.f32 %v712_v15  ;;  %v683_v15 = vand.u32 65535, %v1511_v11 }
 0x248   :  { %v1530_v19 = vsel %vm629_vm8, %v1489_v61, 128  ;;  %v604_v20 = vpop.xlane.xlu1 %603 }
 0x249   :  { %vm630_vm9 = vcmp.eq.f32.partialorder %v1460_v40, %v604_v20  ;;  %v1533_v22 = vcvt.s32.f32 %v726_v6  ;;  %v740_v21 = vshra.s32 %v1530_v19, 16  ;;  %v725_v6 = vand.u32 65535, %v1524_v16 }
 0x24a   :  { %v1539_v18 = vsel %vm630_vm9, %v1489_v61, 128  ;;  %v606_v49 = vpop.xlane.xlu0 %605  ;;  %v685_v11 = vcvt.s32.f32 %v683_v15  ;;  %v1697_v15 = vshrl.u32 %v621_v59, 7 }
 0x24b   :  { %vm631_vm10 = vcmp.eq.f32.partialorder %v1463_v43, %v606_v49  ;;  %729 = vmin.xlane.f32.xlu1 %v1533_v22  ;;  %715 = vmin.xlane.f32.xlu0 %v1535_v30  ;;  %v754_v23 = vshra.s32 %v1539_v18, 16  ;;  %v1551_v28 = vcvt.s32.f32 %v740_v21 }
 0x24c   :  { %v1546_v25 = vsel %vm631_vm10, %v1489_v61, 128  ;;  %v608_v26 = vpop.xlane.xlu1 %607 }
 0x24d   :  { %vm632_vm11 = vcmp.eq.f32.partialorder %v1466_v45, %v608_v26  ;;  %v1549_v37 = vcvt.s32.f32 %v754_v23  ;;  %v768_v29 = vshra.s32 %v1546_v25, 16  ;;  %v727_v26 = vcvt.s32.f32 %v725_v6 }
 0x24e   :  { %v1555_v27 = vsel %vm632_vm11, %v1489_v61, 128  ;;  %v610_v5 = vpop.xlane.xlu0 %609 }
 0x24f   :  { %vm633_vm12 = vcmp.eq.f32.partialorder %v1469_v48, %v610_v5  ;;  %757 = vmin.xlane.f32.xlu1 %v1549_v37  ;;  %743 = vmin.xlane.f32.xlu0 %v1551_v28  ;;  %v782_v32 = vshra.s32 %v1555_v27, 16  ;;  %v1567_v24 = vcvt.s32.f32 %v768_v29 }
 0x250   :  { %v1562_v33 = vsel %vm633_vm12, %v1489_v61, 128  ;;  %v612_v57 = vpop.xlane.xlu1 %611 }
 0x251   :  { %vm634_vm13 = vcmp.eq.f32.partialorder %v1472_v51, %v612_v57  ;;  %v1565_v34 = vcvt.s32.f32 %v782_v32  ;;  %v796_v35 = vshra.s32 %v1562_v33, 16 }
 0x252   :  { %v1571_v38 = vsel %vm634_vm13, %v1489_v61, 128  ;;  %v614_v39 = vpop.xlane.xlu0 %613 }
 0x253   :  { %vm635_vm14 = vcmp.eq.f32.partialorder %v1475_v53, %v614_v39  ;;  %785 = vmin.xlane.f32.xlu1 %v1565_v34  ;;  %771 = vmin.xlane.f32.xlu0 %v1567_v24  ;;  %v810_v40 = vshra.s32 %v1571_v38, 16  ;;  %v1583_v45 = vcvt.s32.f32 %v796_v35 }
 0x254   :  { %v1578_v41 = vsel %vm635_vm14, %v1489_v61, 128  ;;  %v616_v43 = vpop.xlane.xlu1 %615 }
 0x255   :  { %vm636_vm15 = vcmp.eq.f32.partialorder %v1478_v54, %v616_v43  ;;  %v1581_v44 = vcvt.s32.f32 %v810_v40  ;;  %v824_v46 = vshra.s32 %v1578_v41, 16 }
 0x256   :  { %v1587_v48 = vsel %vm636_vm15, %v1489_v61, 128  ;;  %v618_v50 = vpop.xlane.xlu0 %617 }
 0x257   :  { %vm637_vm0 = vcmp.eq.f32.partialorder %v1481_v31, %v618_v50  ;;  %813 = vmin.xlane.f32.xlu1 %v1581_v44  ;;  %799 = vmin.xlane.f32.xlu0 %v1583_v45  ;;  %v838_v51 = vshra.s32 %v1587_v48, 16  ;;  %v1599_v54 = vcvt.s32.f32 %v824_v46 }
 0x258   :  { %v1594_v52 = vsel %vm637_vm0, %v1489_v61, 128  ;;  %v620_v53 = vpop.xlane.xlu1 %619 }
 0x259   :  { %vm638_vm1 = vcmp.eq.f32.partialorder %v1484_v58, %v620_v53  ;;  %v1597_v36 = vcvt.s32.f32 %v838_v51  ;;  %v852_v56 = vshra.s32 %v1594_v52, 16  ;;  %v669_v58 = vand.u32 65535, %v1492_v47 }
 0x25a   :  { %v1603_v31 = vsel %vm638_vm1, %v1489_v61, 128  ;;  %v699_v47 = vcvt.s32.f32 %v697_v7 }
 0x25b   :  { %841 = vmin.xlane.f32.xlu1 %v1597_v36  ;;  %827 = vmin.xlane.f32.xlu0 %v1599_v54  ;;  %v866_v62 = vshra.s32 %v1603_v31, 16  ;;  %v1610_v0 = vcvt.s32.f32 %v852_v56  ;;  %v671_v60 = vcvt.s32.f32 %v669_v58 }
 0x25d   :  { %v1608_v63 = vcvt.s32.f32 %v866_v62 }
 0x25f   :  { %869 = vmin.xlane.f32.xlu1 %v1608_v63  ;;  %855 = vmin.xlane.f32.xlu0 %v1610_v0 }
 0x2c7   :  { %v1616_v42 = vpop.xlane.xlu1 %673 }
 0x2c8   :  { %vm675_vm2 = vcmp.eq.f32.partialorder %v1495_v2, %v1616_v42  ;;  %v711_v2 = vand.u32 65535, %v1517_v13 }
 0x2c9   :  { %v676_v12 = vsel %vm675_vm2, %v671_v60, inf  ;;  %vm888_vm2 = vcmask 130112  }
 0x2ca   :  { %677 = vmin.xlane.f32.xlu1 %v676_v12  ;;  %v713_v13 = vcvt.s32.f32 %v711_v2 }
 0x2cb   :  { %v1621_v55 = vpop.xlane.xlu0 %659 }
 0x2cc   :  { %v1624_v17 = vpop.xlane.xlu1 %701  ;;  %vm661_vm3 = vcmp.eq.f32.partialorder %v1506_v8, %v1621_v55  ;;  %v739_v8 = vand.u32 65535, %v1530_v19  ;;  %v767_v19 = vand.u32 65535, %v1546_v25  ;;  %v795_v25 = vand.u32 65535, %v1562_v33 }
 0x2cd   :  { %vm703_vm4 = vcmp.eq.f32.partialorder %v1508_v9, %v1624_v17  ;;  %v662_v3 = vsel %vm661_vm3, %v657_v10, inf  ;;  %v753_v9 = vand.u32 65535, %v1539_v18  ;;  %v781_v18 = vand.u32 65535, %v1555_v27 }
 0x2ce   :  { %v704_v4 = vsel %vm703_vm4, %v699_v47, inf  ;;  %663 = vmin.xlane.f32.xlu0 %v662_v3  ;;  %v741_v57 = vcvt.s32.f32 %v739_v8  ;;  %v809_v27 = vand.u32 65535, %v1571_v38  ;;  %v769_v43 = vcvt.s32.f32 %v767_v19 }
 0x2cf   :  { %705 = vmin.xlane.f32.xlu1 %v704_v4  ;;  %v755_v32 = vcvt.s32.f32 %v753_v9  ;;  %v783_v40 = vcvt.s32.f32 %v781_v18  ;;  %v823_v33 = vand.u32 65535, %v1578_v41  ;;  %v837_v38 = vand.u32 65535, %v1587_v48 }
 0x2d0   :  { %v1632_v20 = vpop.xlane.xlu0 %687  ;;  %v811_v51 = vcvt.s32.f32 %v809_v27  ;;  %v797_v53 = vcvt.s32.f32 %v795_v25  ;;  %v851_v41 = vand.u32 65535, %v1594_v52  ;;  %v865_v48 = vand.u32 65535, %v1603_v31 }
 0x2d1   :  { %vm689_vm5 = vcmp.eq.f32.partialorder %v1520_v14, %v1632_v20  ;;  %v839_v58 = vcvt.s32.f32 %v837_v38  ;;  %v825_v1 = vcvt.s32.f32 %v823_v33  ;;  %v666_v10 = vcvt.f32.s32 %v1621_v55 }
 0x2d2   :  { %v690_v21 = vsel %vm689_vm5, %v685_v11, inf  ;;  %v867_v31 = vcvt.s32.f32 %v865_v48  ;;  %v853_v7 = vcvt.s32.f32 %v851_v41  ;;  %v883_v47 = vadd.s32 4294967288, %v1489_v61 }
 0x2d3   :  { %691 = vmin.xlane.f32.xlu0 %v690_v21  ;;  %v708_v4 = vcvt.f32.s32 %v1624_v17  ;;  %v694_v2 = vcvt.f32.s32 %v1632_v20  ;;  %v667_v21 = vshll.u32 %v666_v10, 16  ;;  %v881_v17 = vsub.s32 %v1489_v61, %v1697_v15 }
 0x2d4   :  { %v1638_v49 = vpop.xlane.xlu1 %729  ;;  %v1640_v23 = vpop.xlane.xlu0 %715  ;;  %v886_v59 = vsub.s32 %v883_v47, %v1697_v15  ;;  %v904_v38 = vadd.s32 4294967264, %v1489_v61  ;;  %vm895_vm3 = vcmask 195712   ;;  %vm902_vm4 = vcmask 261312  }
 0x2d5   :  { %vm731_vm6 = vcmp.eq.f32.partialorder %v1533_v22, %v1638_v49  ;;  %vm717_vm7 = vcmp.eq.f32.partialorder %v1535_v30, %v1640_v23  ;;  %v722_v11 = vcvt.f32.s32 %v1640_v23  ;;  %v709_v9 = vshll.u32 %v708_v4, 16 }
 0x2d6   :  { %v732_v16 = vsel %vm731_vm6, %v727_v26, inf  ;;  %v718_v14 = vsel %vm717_vm7, %v713_v13, inf  ;;  %v890_v23 = vadd.s32 4294967280, %v1489_v61  ;;  %vm909_vm5 = vcmask 326912  }
 0x2d7   :  { %733 = vmin.xlane.f32.xlu1 %v732_v16  ;;  %719 = vmin.xlane.f32.xlu0 %v718_v14  ;;  %v695_v16 = vshll.u32 %v694_v2, 16  ;;  %v723_v19 = vshll.u32 %v722_v11, 16  ;;  %vm916_vm6 = vcmask 392512   ;;  %v932_v11 = vadd.s32 4294967232, %v1489_v61 }
 0x2d8   :  { %v1648_v29 = vpop.xlane.xlu1 %757  ;;  %v1650_v5 = vpop.xlane.xlu0 %743  ;;  %vm923_vm7 = vcmask 458112  }
 0x2d9   :  { %vm759_vm8 = vcmp.eq.f32.partialorder %v1549_v37, %v1648_v29  ;;  %vm745_vm9 = vcmp.eq.f32.partialorder %v1551_v28, %v1650_v5  ;;  %v764_v55 = vcvt.f32.s32 %v1648_v29  ;;  %v750_v14 = vcvt.f32.s32 %v1650_v5 }
 0x2da   :  { %v760_v22 = vsel %vm759_vm8, %v755_v32, inf  ;;  %v746_v30 = vsel %vm745_vm9, %v741_v57, inf  ;;  %v911_v5 = vadd.s32 4294967256, %v1489_v61  ;;  %vm930_vm8 = vcmask 523712  }
 0x2db   :  { %761 = vmin.xlane.f32.xlu1 %v760_v22  ;;  %747 = vmin.xlane.f32.xlu0 %v746_v30  ;;  %v765_v57 = vshll.u32 %v764_v55, 16  ;;  %vm937_vm9 = vcmask 589312  }
 0x2dc   :  { %v1658_v35 = vpop.xlane.xlu1 %785  ;;  %v1660_v39 = vpop.xlane.xlu0 %771  ;;  %v914_v48 = vsub.s32 %v911_v5, %v1697_v15 }
 0x2dd   :  { %vm787_vm10 = vcmp.eq.f32.partialorder %v1565_v34, %v1658_v35  ;;  %vm773_vm11 = vcmp.eq.f32.partialorder %v1567_v24, %v1660_v39  ;;  %v792_v22 = vcvt.f32.s32 %v1658_v35  ;;  %v778_v30 = vcvt.f32.s32 %v1660_v39 }
 0x2de   :  { %v788_v37 = vsel %vm787_vm10, %v783_v40, inf  ;;  %v774_v28 = vsel %vm773_vm11, %v769_v43, inf  ;;  %v925_v39 = vadd.s32 4294967240, %v1489_v61  ;;  %vm944_vm10 = vcmask 654912  }
 0x2df   :  { %789 = vmin.xlane.f32.xlu1 %v788_v37  ;;  %775 = vmin.xlane.f32.xlu0 %v774_v28  ;;  %v751_v37 = vshll.u32 %v750_v14, 16  ;;  %v893_v28 = vsub.s32 %v890_v23, %v1697_v15  ;;  %v935_v23 = vsub.s32 %v932_v11, %v1697_v15  ;;  %vm951_vm11 = vcmask 720512  }
 0x2e0   :  { %v1668_v46 = vpop.xlane.xlu1 %813  ;;  %v1670_v50 = vpop.xlane.xlu0 %799 }
 0x2e1   :  { %vm815_vm12 = vcmp.eq.f32.partialorder %v1581_v44, %v1668_v46  ;;  %vm801_vm13 = vcmp.eq.f32.partialorder %v1583_v45, %v1670_v50  ;;  %v820_v25 = vcvt.f32.s32 %v1668_v46 }
 0x2e2   :  { %v816_v34 = vsel %vm815_vm12, %v811_v51, inf  ;;  %v802_v24 = vsel %vm801_vm13, %v797_v53, inf  ;;  %v806_v51 = vcvt.f32.s32 %v1670_v50  ;;  %v907_v50 = vsub.s32 %v904_v38, %v1697_v15 }
 0x2e3   :  { %817 = vmin.xlane.f32.xlu1 %v816_v34  ;;  %803 = vmin.xlane.f32.xlu0 %v802_v24  ;;  %v793_v34 = vshll.u32 %v792_v22, 16  ;;  %v779_v24 = vshll.u32 %v778_v30, 16  ;;  %v1720_v41 = vshll.u32 %v820_v25, 16  ;;  %v960_v38 = vadd.s32 4294967200, %v1489_v61 }
 0x2e4   :  { %v1678_v56 = vpop.xlane.xlu1 %841  ;;  %v1680_v62 = vpop.xlane.xlu0 %827  ;;  %vm958_vm12 = vcmask 786112   ;;  %vm965_vm13 = vcmask 851712  }
 0x2e5   :  { %vm843_vm14 = vcmp.eq.f32.partialorder %v1597_v36, %v1678_v56  ;;  %vm829_vm15 = vcmp.eq.f32.partialorder %v1599_v54, %v1680_v62  ;;  %v680_v54 = vcvt.f32.s32 %v1616_v42  ;;  %v897_v42 = vadd.s32 4294967272, %v1489_v61 }
 0x2e6   :  { %v844_v44 = vsel %vm843_vm14, %v839_v58, inf  ;;  %v830_v45 = vsel %vm829_vm15, %v825_v1, inf  ;;  %vm972_vm14 = vcmask 917312   ;;  %vm979_vm15 = vcmask 982912  }
 0x2e7   :  { %845 = vmin.xlane.f32.xlu1 %v844_v44  ;;  %831 = vmin.xlane.f32.xlu0 %v830_v45  ;;  %v681_v6 = vshll.u32 %v680_v54, 16  ;;  %v900_v18 = vsub.s32 %v897_v42, %v1697_v15  ;;  %v918_v44 = vadd.s32 4294967248, %v1489_v61  ;;  %v928_v54 = vsub.s32 %v925_v39, %v1697_v15 }
 0x2e8   :  { %v1686_v60 = vpop.xlane.xlu1 %869  ;;  %v1688_v52 = vpop.xlane.xlu0 %855 }
 0x2e9   :  { %vm871_vm0 = vcmp.eq.f32.partialorder %v1608_v63, %v1686_v60  ;;  %vm857_vm1 = vcmp.eq.f32.partialorder %v1610_v0, %v1688_v52  ;;  %v736_v0 = vcvt.f32.s32 %v1638_v49  ;;  %v921_v2 = vsub.s32 %v918_v44, %v1697_v15 }
 0x2ea   :  { %v872_v36 = vsel %vm871_vm0, %v867_v31, inf  ;;  %v858_v12 = vsel %vm857_vm1, %v853_v7, inf  ;;  %v981_v44 = vadd.s32 4294967176, %v1489_v61  ;;  %vm986_vm0 = vcmask 1048512  }
 0x2eb   :  { %873 = vmin.xlane.f32.xlu1 %v872_v36  ;;  %859 = vmin.xlane.f32.xlu0 %v858_v12  ;;  %v737_v49 = vshll.u32 %v736_v0, 16  ;;  %v807_v36 = vshll.u32 %v806_v51, 16 }
 0x353   :  { %v678_v3 = vpop.xlane.xlu1 %677 }
 0x354   :  { %v679_v63 = vcvt.f32.s32 %v678_v3 }
 0x356   :  { %v682_v26 = vadd.s32 %v681_v6, %v679_v63  ;;  %v939_v6 = vadd.s32 4294967224, %v1489_v61 }
 0x357   :  { %v664_v8 = vpop.xlane.xlu0 %663 }
 0x358   :  { %v706_v13 = vpop.xlane.xlu1 %705  ;;  %v665_v20 = vcvt.f32.s32 %v664_v8  ;;  %v887_v27 = vrot.slane %v682_v26, %v886_v59  ;;  %v848_v8 = vcvt.f32.s32 %v1678_v56  ;;  %v946_v56 = vadd.s32 4294967216, %v1489_v61 }
 0x359   :  { %v707_v29 = vcvt.f32.s32 %v706_v13 }
 0x35a   :  { %v668_v32 = vadd.s32 %v667_v21, %v665_v20  ;;  %v953_v20 = vadd.s32 4294967208, %v1489_v61  ;;  %v849_v22 = vshll.u32 %v848_v8, 16 }
 0x35b   :  { %v710_v53 = vadd.s32 %v709_v9, %v707_v29  ;;  %v834_v9 = vcvt.f32.s32 %v1680_v62 }
 0x35c   :  { %v882_v40 = vrot.slane %v668_v32, %v881_v17  ;;  %v692_v43 = vpop.xlane.xlu0 %691 }
 0x35d   :  { %v693_v33 = vcvt.f32.s32 %v692_v43  ;;  %v901_v12 = vrot.slane %v710_v53, %v900_v18  ;;  %v835_v30 = vshll.u32 %v834_v9, 16  ;;  %v956_v43 = vsub.s32 %v953_v20, %v1697_v15 }
 0x35e   :  { %v889_v35 = vsel %vm888_vm2, %v887_v27, %v882_v40 }
 0x35f   :  { %v696_v46 = vadd.s32 %v695_v16, %v693_v33 }
 0x360   :  { %v734_v58 = vpop.xlane.xlu1 %733  ;;  %v720_v1 = vpop.xlane.xlu0 %719 }
 0x361   :  { %v894_v45 = vrot.slane %v696_v46, %v893_v28  ;;  %v735_v31 = vcvt.f32.s32 %v734_v58  ;;  %v721_v7 = vcvt.f32.s32 %v720_v1  ;;  %v949_v28 = vsub.s32 %v946_v56, %v1697_v15 }
 0x362   :  { %v876_v46 = vcvt.f32.s32 %v1686_v60  ;;  %v974_v60 = vadd.s32 4294967184, %v1489_v61 }
 0x363   :  { %v896_v10 = vsel %vm895_vm3, %v894_v45, %v889_v35  ;;  %v738_v47 = vadd.s32 %v737_v49, %v735_v31  ;;  %v724_v3 = vadd.s32 %v723_v19, %v721_v7  ;;  %v942_v49 = vsub.s32 %v939_v6, %v1697_v15 }
 0x364   :  { %v903_v4 = vsel %vm902_vm4, %v901_v12, %v896_v10  ;;  %v762_v63 = vpop.xlane.xlu1 %761  ;;  %v748_v0 = vpop.xlane.xlu0 %747 }
 0x365   :  { %v915_v42 = vrot.slane %v738_v47, %v914_v48  ;;  %v908_v21 = vrot.slane %v724_v3, %v907_v50  ;;  %v763_v55 = vcvt.f32.s32 %v762_v63  ;;  %v749_v59 = vcvt.f32.s32 %v748_v0 }
 0x366   :  { %v963_v50 = vsub.s32 %v960_v38, %v1697_v15  ;;  %v877_v47 = vshll.u32 %v876_v46, 16  ;;  %v984_v63 = vsub.s32 %v981_v44, %v1697_v15  ;;  %v977_v0 = vsub.s32 %v974_v60, %v1697_v15 }
 0x367   :  { %v910_v26 = vsel %vm909_vm5, %v908_v21, %v903_v4  ;;  %v766_v13 = vadd.s32 %v765_v57, %v763_v55  ;;  %v752_v17 = vadd.s32 %v751_v37, %v749_v59  ;;  %v967_v57 = vadd.s32 4294967192, %v1489_v61 }
 0x368   :  { %v917_v16 = vsel %vm916_vm6, %v915_v42, %v910_v26  ;;  %v790_v14 = vpop.xlane.xlu1 %789  ;;  %v776_v19 = vpop.xlane.xlu0 %775 }
 0x369   :  { %v929_v18 = vrot.slane %v766_v13, %v928_v54  ;;  %v922_v62 = vrot.slane %v752_v17, %v921_v2  ;;  %v791_v29 = vcvt.f32.s32 %v790_v14  ;;  %v777_v32 = vcvt.f32.s32 %v776_v19 }
 0x36b   :  { %v924_v25 = vsel %vm923_vm7, %v922_v62, %v917_v16  ;;  %v794_v27 = vadd.s32 %v793_v34, %v791_v29  ;;  %v780_v40 = vadd.s32 %v779_v24, %v777_v32  ;;  %v862_v34 = vcvt.f32.s32 %v1688_v52 }
 0x36c   :  { %v931_v5 = vsel %vm930_vm8, %v929_v18, %v924_v25  ;;  %v818_v37 = vpop.xlane.xlu1 %817  ;;  %v804_v33 = vpop.xlane.xlu0 %803  ;;  %v970_v24 = vsub.s32 %v967_v57, %v1697_v15 }
 0x36d   :  { %v943_v51 = vrot.slane %v794_v27, %v942_v49  ;;  %v936_v53 = vrot.slane %v780_v40, %v935_v23  ;;  %v819_v35 = vcvt.f32.s32 %v818_v37  ;;  %v805_v39 = vcvt.f32.s32 %v804_v33 }
 0x36e   :  { %v863_v3 = vshll.u32 %v862_v34, 16 }
 0x36f   :  { %v938_v48 = vsel %vm937_vm9, %v936_v53, %v931_v5  ;;  %v822_v58 = vadd.s32 %v1720_v41, %v819_v35  ;;  %v808_v1 = vadd.s32 %v807_v36, %v805_v39 }
 0x370   :  { %v945_v45 = vsel %vm944_vm10, %v943_v51, %v938_v48  ;;  %v846_v31 = vpop.xlane.xlu1 %845  ;;  %v832_v7 = vpop.xlane.xlu0 %831 }
 0x371   :  { %v957_v52 = vrot.slane %v822_v58, %v956_v43  ;;  %v950_v12 = vrot.slane %v808_v1, %v949_v28  ;;  %v847_v54 = vcvt.f32.s32 %v846_v31  ;;  %v833_v10 = vcvt.f32.s32 %v832_v7 }
 0x373   :  { %v952_v41 = vsel %vm951_vm11, %v950_v12, %v945_v45  ;;  %v850_v36 = vadd.s32 %v849_v22, %v847_v54  ;;  %v836_v4 = vadd.s32 %v835_v30, %v833_v10 }
 0x374   :  { %v874_v2 = vpop.xlane.xlu1 %873  ;;  %v860_v6 = vpop.xlane.xlu0 %859  ;;  %v959_v11 = vsel %vm958_vm12, %v957_v52, %v952_v41 }
 0x375   :  { %v971_v61 = vrot.slane %v850_v36, %v970_v24  ;;  %v964_v42 = vrot.slane %v836_v4, %v963_v50  ;;  %v875_v21 = vcvt.f32.s32 %v874_v2  ;;  %v861_v55 = vcvt.f32.s32 %v860_v6 }
 0x377   :  { %v878_v59 = vadd.s32 %v877_v47, %v875_v21  ;;  %v864_v8 = vadd.s32 %v863_v3, %v861_v55  ;;  %v966_v9 = vsel %vm965_vm13, %v964_v42, %v959_v11 }
 0x378   :  { %v973_v26 = vsel %vm972_vm14, %v971_v61, %v966_v9 }
 0x379   :  { %v985_v13 = vrot.slane %v878_v59, %v984_v63  ;;  %v978_v17 = vrot.slane %v864_v8, %v977_v0 }
 0x37b   :  { %v980_v20 = vsel %vm979_vm15, %v978_v17, %v973_v26 }
 0x37c   :  { %v987_v15 = vsel %vm986_vm0, %v985_v13, %v980_v20 }
 0x37d   :  { %988 = vst [vmem:[#allocation2] sm:$0x1] %v987_v15 }
 0x37e   :  { %1179 = shalt.err (!%p1176_p4)
}
 0x37f   :  { %998 = dma.vmem_to_hbm [thread:$0]  %s996_s11, 16, %s1764_s5, [#allocation3]  }
 0x380   :  { %1188 = dma.done.wait [#allocation3], 16  }
 0x381   :  { %1189 = vsyncadd [#allocation3], 4294967280 }
 0x382   :  { %1002 = vsyncpa [#allocation3], 1 }

</bundles_post_ra>
